<compile_context>
chip_gen: v6e
topology: v6e:2x2x1
jax: 0.10.0
libtpu: 0.0.40
codegen_flags: <defaults>
</compile_context>

<pallas_src>
import functools

import jax
import jax.numpy as jnp
from jax import lax
from jax.experimental import pallas as pl
from jax.experimental.pallas import tpu as pltpu


def _round_up(x, m):
    return (x + m - 1) // m * m


def _s2_kernel(w_ref, x_ref, out_ref, *, activation):
    # w_ref:   (P_pad, K_pad)      fused weights (-2*patches | +1 xs | pss bias)
    # x_ref:   (1, K_pad, n_seg)   one (scale, batch) im2col segment
    # out_ref: (1, P_pad, n_seg)
    dist = jnp.dot(w_ref[...], x_ref[0], preferred_element_type=jnp.float32)
    if activation == 'gaussian':
        out = jnp.exp(dist)                      # -1/(2*sigma^2) folded into w
    elif activation == 'euclidean':
        out = jnp.sqrt(jnp.maximum(dist, 0.0))
    else:
        raise ValueError("activation must be 'gaussian' or 'euclidean'")
    out_ref[0] = out.astype(out_ref.dtype)


def _build_weights(patches, activation, sigma):
    """Fused weight matrix so that w @ im2col == dist directly.

    K layout per kernel offset (i, j): [-2 * patches[:, :, i, j] (O cols), +1 (xs)],
    then one bias column = patches_sum_sq, then zero padding to a multiple of 8.
    """
    P, O, size, _ = patches.shape
    K_raw = size * size * (O + 1) + 1
    K_pad = _round_up(K_raw, 8)
    P_pad = _round_up(P, 8)
    pss = jnp.sum(patches.astype(jnp.float32) ** 2, axis=(1, 2, 3))          # (P,)
    parts = []
    for i in range(size):
        for j in range(size):
            parts.append(-2.0 * patches[:, :, i, j].astype(jnp.float32))     # (P, O)
            parts.append(jnp.ones((P, 1), jnp.float32))                      # xs weight
    parts.append(pss[:, None])                                               # pss bias
    w = jnp.concatenate(parts, axis=1)                                       # (P, K_raw)
    if activation == 'gaussian':
        w = w * (-1.0 / (2.0 * float(sigma) ** 2))
    w = jnp.pad(w, ((0, P_pad - P), (0, K_pad - K_raw)))
    return w, K_raw, K_pad, P_pad


def _im2col_scale(c1, size):
    """(B, O, H, W) -> (B, K_raw, Hout*Wout) im2col with the xs channel and a
    trailing ones (bias) row; K ordering matches _build_weights."""
    B, O, H, W = c1.shape
    pad_lo = size // 2 - 1                 # folds the PyTorch [:, :, 1:, 1:] crop
    pad_hi = size // 2
    Hp, Wp = H + pad_lo + pad_hi, W + pad_lo + pad_hi
    Hout, Wout = Hp - size + 1, Wp - size + 1
    c1 = c1.astype(jnp.float32)
    xs = jnp.sum(c1 * c1, axis=1, keepdims=True)                  # (B, 1, H, W)
    xa = jnp.concatenate([c1, xs], axis=1)                        # (B, O+1, H, W)
    xp = jnp.pad(xa, ((0, 0), (0, 0), (pad_lo, pad_hi), (pad_lo, pad_hi)))
    cols = []
    for i in range(size):
        for j in range(size):
            cols.append(xp[:, :, i:i + Hout, j:j + Wout])         # (B, O+1, Hout, Wout)
    col = jnp.stack(cols, axis=1)                                 # (B, ss, O+1, Hout, Wout)
    col = col.reshape(B, size * size * (O + 1), Hout * Wout)      # K = (i*size+j)*(O+1)+c
    ones = jnp.ones((B, 1, Hout * Wout), jnp.float32)             # bias row for pss
    return jnp.concatenate([col, ones], axis=1), Hout, Wout       # (B, K_raw, n_out)


def s2_forward(c1_outputs, patches, activation='euclidean', sigma=1.0):
    """Equivalent of S2.forward: list of (B, O, H, W) -> list of (B, P, H', W').
    All scales and batch elements fused into a single pallas_call."""
    P, O, size, _ = patches.shape
    assert size >= 2, "asymmetric-pad folding of the [1:, 1:] crop requires size >= 2"
    w, K_raw, K_pad, P_pad = _build_weights(patches, activation, sigma)

    per_scale = []
    n_seg = 128
    for c1 in c1_outputs:
        assert c1.shape[1] == O
        col, Hout, Wout = _im2col_scale(c1, size)
        per_scale.append((col, c1.shape[0], Hout, Wout))
        n_seg = max(n_seg, _round_up(Hout * Wout, 128))           # common lane-aligned width

    segments = []
    for col, B, Hout, Wout in per_scale:
        n_out = Hout * Wout
        segments.append(jnp.pad(col, ((0, 0), (0, K_pad - K_raw), (0, n_seg - n_out))))
    x_all = jnp.concatenate(segments, axis=0)                     # (num_segments, K_pad, n_seg)
    num_segments = x_all.shape[0]

    kern = functools.partial(_s2_kernel, activation=activation)
    out_all = pl.pallas_call(
        kern,
        out_shape=jax.ShapeDtypeStruct((num_segments, P_pad, n_seg), jnp.float32),
        grid=(num_segments,),
        in_specs=[
            pl.BlockSpec((P_pad, K_pad), lambda s: (0, 0)),        # weights, resident
            pl.BlockSpec((1, K_pad, n_seg), lambda s: (s, 0, 0)),  # one segment per step
        ],
        out_specs=pl.BlockSpec((1, P_pad, n_seg), lambda s: (s, 0, 0)),
        compiler_params=pltpu.CompilerParams(dimension_semantics=("parallel",)),
    )(w, x_all)

    # Un-fuse: crop the padded patch rows / lane tail and restore (B, P, H', W').
    results, off = [], 0
    for _, B, Hout, Wout in per_scale:
        seg = out_all[off:off + B, :P, :Hout * Wout]               # (B, P, n_out)
        off += B
        results.append(seg.reshape(B, P, Hout, Wout))
    return results


def s2_reference(c1, patches, activation='euclidean', sigma=1.0):
    """Pure-JAX reference reproducing the PyTorch forward exactly."""
    P, O, s, _ = patches.shape
    pad = s // 2
    w = jnp.transpose(patches, (1, 0, 2, 3)).reshape(O * P, 1, s, s)
    conv = lax.conv_general_dilated(
        c1, w, (1, 1), [(pad, pad), (pad, pad)],
        dimension_numbers=('NCHW', 'OIHW', 'NCHW'), feature_group_count=O)
    conv = conv[:, :, 1:, 1:]
    S = conv.shape[-1]
    conv = conv.reshape(-1, O, P, S, S).sum(axis=1)
    ones = jnp.ones((1, 1, s, s), c1.dtype)
    c1sq = lax.conv_general_dilated(
        jnp.sum(c1 ** 2, axis=1, keepdims=True), ones, (1, 1),
        [(pad, pad), (pad, pad)], dimension_numbers=('NCHW', 'OIHW', 'NCHW'))
    c1sq = c1sq[:, :, 1:, 1:]
    pss = jnp.sum(patches ** 2, axis=(1, 2, 3))
    dist = c1sq - 2.0 * conv + pss[None, :, None, None]
    if activation == 'gaussian':
        return jnp.exp((-1.0 / (2.0 * sigma ** 2)) * dist)
    return jnp.sqrt(jnp.maximum(dist, 0.0))


if __name__ == "__main__":
    key = jax.random.PRNGKey(0)
    k_p, k_a, k_b = jax.random.split(key, 3)

    num_patches, num_orientations, size = 8, 4, 4
    patches = jax.random.normal(
        k_p, (num_patches, num_orientations, size, size), dtype=jnp.float32) * 0.1

    # Two C1 scales, mimicking the list input of the module.
    c1_outputs = [
        jax.random.normal(k_a, (2, num_orientations, 16, 16), dtype=jnp.float32),
        jax.random.normal(k_b, (2, num_orientations, 12, 12), dtype=jnp.float32),
    ]

    for act, sig in (('euclidean', 1.0), ('gaussian', 6.0)):
        outs = s2_forward(c1_outputs, patches, activation=act, sigma=sig)
        outs = [jax.block_until_ready(o) for o in outs]
        for c1, o in zip(c1_outputs, outs):
            ref = jax.block_until_ready(s2_reference(c1, patches, act, sig))
            assert o.shape == ref.shape, (act, o.shape, ref.shape)
            err = float(jnp.max(jnp.abs(o - ref)))
            assert jnp.allclose(o, ref, atol=1e-3, rtol=1e-3), (act, err)

    print("KERNEL_OK")
</pallas_src>

<mosaic_0001>
module attributes {stable_mosaic.version = 11 : i64} {
  func.func @_s2_kernel(%arg0: i32, %arg1: memref<8x88xf32, #tpu.memory_space<vmem>>, %arg2: memref<1x88x256xf32, #tpu.memory_space<vmem>>, %arg3: memref<1x8x256xf32, #tpu.memory_space<vmem>>) attributes {dimension_semantics = [#tpu.dimension_semantics<parallel>], iteration_bounds = array<i64: 4>, scalar_prefetch = 0 : i64, scratch_operands = 0 : i64, tpu.core_type = #tpu.core_type<tc>, window_params = [{pipeline_mode = #tpu.pipeline_mode<synchronous>, transform_indices = @transform_0, window_bounds = array<i64: 8, 88>}, {transform_indices = @transform_1, window_bounds = array<i64: 1, 88, 256>}, {transform_indices = @transform_2, window_bounds = array<i64: 1, 8, 256>}]} {
    %c0 = arith.constant 0 : index
    %c0_0 = arith.constant 0 : index
    %0 = vector.load %arg1[%c0, %c0_0] : memref<8x88xf32, #tpu.memory_space<vmem>>, vector<8x88xf32>
    %c0_1 = arith.constant 0 : index
    %c0_2 = arith.constant 0 : index
    %c0_3 = arith.constant 0 : index
    %1 = vector.load %arg2[%c0_1, %c0_2, %c0_3] : memref<1x88x256xf32, #tpu.memory_space<vmem>>, vector<1x88x256xf32>
    %2 = vector.shape_cast %1 : vector<1x88x256xf32> to vector<88x256xf32>
    %cst = arith.constant dense<0.000000e+00> : vector<8x256xf32>
    %3 = tpu.matmul %0, %2, %cst {dimension_numbers = #tpu.dot_dimension_numbers<[1], [0], [0], [1], [0, 0, 1, 1], [], []>} : vector<8x88xf32>, vector<88x256xf32>, vector<8x256xf32> -> vector<8x256xf32>
    %cst_4 = arith.constant 0.000000e+00 : f32
    %4 = vector.broadcast %cst_4 : f32 to vector<8x256xf32>
    %5 = arith.maximumf %3, %4 : vector<8x256xf32>
    %6 = math.sqrt %5 : vector<8x256xf32>
    %c0_5 = arith.constant 0 : index
    %c0_6 = arith.constant 0 : index
    %c0_7 = arith.constant 0 : index
    %7 = vector.load %arg3[%c0_5, %c0_6, %c0_7] : memref<1x8x256xf32, #tpu.memory_space<vmem>>, vector<1x8x256xf32>
    %8 = vector.shape_cast %7 : vector<1x8x256xf32> to vector<8x256xf32>
    %9 = vector.shape_cast %6 : vector<8x256xf32> to vector<1x8x256xf32>
    tpu.vector_store %arg3[%c0_5, %c0_6, %c0_7], %9 {strides = array<i32>} : memref<1x8x256xf32, #tpu.memory_space<vmem>>, vector<1x8x256xf32>,
    return
  }
  func.func @transform_0(%arg0: i32) -> (i32, i32) {
    %c0_i32 = arith.constant 0 : i32
    %c0_i32_0 = arith.constant 0 : i32
    %c0_i32_1 = arith.constant 0 : i32
    return %c0_i32, %c0_i32_0 : i32, i32
  }
  func.func @transform_1(%arg0: i32) -> (i32, i32, i32) {
    %c0_i32 = arith.constant 0 : i32
    %c0_i32_0 = arith.constant 0 : i32
    %c0_i32_1 = arith.constant 0 : i32
    return %arg0, %c0_i32, %c0_i32_0 : i32, i32, i32
  }
  func.func @transform_2(%arg0: i32) -> (i32, i32, i32) {
    %c0_i32 = arith.constant 0 : i32
    %c0_i32_0 = arith.constant 0 : i32
    %c0_i32_1 = arith.constant 0 : i32
    return %arg0, %c0_i32, %c0_i32_0 : i32, i32, i32
  }
}

</mosaic_0001>

<bundles_post_ra>
// kernel: tpu_custom_call.1
= control target key start
LH: loop header
LB: loop body
LE: loop exit
PB: predicated region body
PF: predicated region fallthrough
CT: control target
= control target key end

     0   :  { %7 = vsyncpa [#allocation3], 0  ;;  %s811_s0 = inlined_call_operand.hbm [shape: f32[8,88], index: 0, kind: input, shape index: {}]   ;;  %s812_s1 = inlined_call_operand.hbm [shape: f32[4,88,256], index: 1, kind: input, shape index: {}]   ;;  %s813_s2 = inlined_call_operand.hbm [shape: f32[4,8,256], index: 2, kind: output, shape index: {}]  }
   0x1   :  { %8 = vsyncpa [#allocation6], 0 }
   0x2   :  { %10 = vsyncpa [#allocation6 + $0x1], 0 }
   0x3   :  { %11 = vsyncpa [#allocation4], 0 }
   0x4   :  { %13 = vsyncpa [#allocation4 + $0x1], 0  ;;  %s615_s9 = smov 0   ;;  %s617_s10 = smov 0  }
   0x5   :  { %s619_s11 = smov 0   ;;  %s621_s12 = smov 0  }
   0x6 LB: > { %s636_s13 = sadd.s32 4294967295, %s592_s12   ;;  %s388_s14 = sadd.s32 4294967294, %s592_s12   ;;  %s592_s12 = sphi %s621_s12, %s834_s12   ;;  %s588_s11 = sphi %s619_s11, %s833_s11   ;;  %s584_s10 = sphi %s617_s10, %s832_s10   ;;  %s580_s9 = sphi %s615_s9, %s831_s9  }
   0x7   : > { %s640_s15 = sadd.s32 1, %s592_s12   ;;  %s47_s16 = sadd.s32 1, %s588_s11 }
   0x8   : > { %s44_s17 = ssub.s32 %s592_s12, %s640_s15  ;;  %p54_p0 = scmp.ne.s32.totalorder %s588_s11, %s584_s10 }
   0x9   : > { %p45_p1 = scmp.eq.s32.totalorder %s44_s17, 0  ;;  %p55_p2 = scmp.eq.s32.totalorder %s592_s12, 0 }
   0xa   : > { %p60_p3 = scmp.ne.s32.totalorder %s584_s10, %s580_s9  ;;  %p815_p4 = scmp.eq.s32.totalorder %s636_s13, 0 }
   0xb   : > { %s652_s18 = scalar_select %p45_p1, %s588_s11, %s47_s16  }
   0xc   : > { %p654_p5 = por %p55_p2, %p54_p0  ;;  %p660_p6 = por %p815_p4, %p60_p3 }
   0xd   : > { %p84_p7 = scmp.eq.s32.totalorder %s636_s13, 3  ;;  %p90_p8 = scmp.eq.s32.totalorder %s388_s14, 3 }
   0xe   : > { %s819_s20 = scalar_select %p660_p6, 1, 0 }
   0xf   : > { %p389_p9 = scmp.ge.s32.totalorder %s592_s12, 1  ;;  %p97_p10 = scmp.lt.s32.totalorder %s592_s12, 5 }
  0x10   : > { %p667_p11 = por %p84_p7, %p54_p0  ;;  %p671_p12 = por %p90_p8, %p60_p3 }
  0x11   : > { %p675_p13 = pnand %p389_p9, %p97_p10  ;;  %s594_s24 = smov [#allocation2]  }
  0x12   : > { %s820_s21 = scalar_select %p667_p11, 1, 0 }
  0x13   : > { %s821_s22 = scalar_select %p671_p12, 1, 0 }
  0x14   : > { %s822_s23 = scalar_select %p675_p13, 1, 0 }
  0x15   : > { %p414_p1 = pneg %p675_p13  ;;  %s110_s25 = sshll.u32 %s594_s24, 4  ;;  %s111_s25 = int_to_ptr.vmem [resolvable:$true] %s110_s25 }
  0x16   : > { %p427_p2 = scmp.lt.s32.totalorder %s592_s12, 4  ;;  %s121_s27 = sand.u32 1, %s588_s11  }
  0x17   : > { %p684_p0 = pnand %p414_p1, %p815_p4  ;;  %s403_s29 = smul.u32 176, %s121_s27 }
  0x18   : > { %p691_p3 = pnand %p427_p2, %p654_p5  ;;  %s481_s30 = scalar_lea.vmem %s111_s25, 128 }
  0x19   : > { %p472_p7 = pneg %p684_p0  ;;  %p482_p8 = scmp.ne.s32.totalorder %s111_s25, %s481_s30 }
  0x1a   : > { %p489_p12 = scmp.lt.s32.totalorder %s111_s25, %s111_s25  ;;  %p490_p11 = scmp.lt.s32.totalorder %s481_s30, %s481_s30 }
  0x1b   : > { %p484_p9 = pnand %p482_p8, %p472_p7 }
  0x1c   : > { %p491_p1 = por %p490_p11, %p489_p12 }
  0x1d   : > { %p485_p10 = pneg %p484_p9 }
  0x1f   : > { %p492_p4 = pnand %p491_p1, %p485_p10 }
  0x21   : > { %495 = shalt.err (!%p492_p4)
}
  0x22   : > { %417 = dma.hbm_to_vmem [thread:$0]  (!%p684_p0), %s811_s0, 128, %s111_s25, [#allocation3]  }
  0x23   : > { %s404_s5 = smul.u32 2816, %s592_s12  ;;  %s125_s6 = scalar_lea.vmem [#allocation5], %s403_s29 }
  0x24   : > { %s132_s7 = sshll.u32 %s125_s6, 4  ;;  %s710_s17 = scalar_lea.sflag [#allocation6], %s121_s27  ;;  %s703_s7 = int_to_ptr.vmem [resolvable:$true] %s132_s7 }
  0x25   : > { %s708_s16 = scalar_lea.hbm %s812_s1, %s404_s5  ;;  %p498_p5 = pneg %p691_p3 }
  0x26   : > { %s496_s19 = scalar_lea.hbm %s708_s16, 2816  ;;  %s501_s26 = scalar_lea.hbm %s812_s1, 11264 }
  0x27   : > { %p497_p4 = scmp.ne.s32.totalorder %s708_s16, %s496_s19  ;;  %p502_p2 = scmp.lt.s32.totalorder %s708_s16, %s812_s1 }
  0x28   : > { %p503_p0 = scmp.lt.s32.totalorder %s501_s26, %s496_s19 }
  0x29   : > { %p499_p11 = pnand %p498_p5, %p497_p4 }
  0x2a   : > { %p504_p7 = por %p503_p0, %p502_p2 }
  0x2b   : > { %p500_p12 = pneg %p499_p11 }
  0x2d   : > { %p505_p8 = pnand %p504_p7, %p500_p12 }
  0x2f   : > { %508 = shalt.err (!%p505_p8)
}
  0x30   : > { %s509_s27 = scalar_lea.vmem %s703_s7, 2816  ;;  %s595_s3 = smov [#allocation5]  }
  0x31   : > { %p510_p9 = scmp.ne.s32.totalorder %s703_s7, %s509_s27  ;;  %s514_s4 = sshll.u32 %s595_s3, 4  ;;  %s515_s4 = int_to_ptr.vmem [resolvable:$false] %s514_s4 }
  0x32   : > { %s516_s5 = scalar_lea.vmem %s515_s4, 5632  ;;  %p517_p4 = scmp.lt.s32.totalorder %s703_s7, %s515_s4 }
  0x33   : > { %p512_p10 = pnand %p510_p9, %p498_p5  ;;  %p518_p11 = scmp.lt.s32.totalorder %s516_s5, %s509_s27 }
  0x35   : > { %p513_p1 = pneg %p512_p10  ;;  %p519_p6 = por %p518_p11, %p517_p4 }
  0x37   : > { %p520_p13 = pnand %p519_p6, %p513_p1 }
  0x39   : > { %523 = shalt.err (!%p520_p13)
}
  0x3a   : > { %s596_s6 = smov 256   ;;  %s597_s8 = smov 16  }
  0x3b   : > { %421 = dma.hbm_to_vmem [thread:$0]  (!%p691_p3), %s708_s16, 2816, %s703_s7, %s710_s17, %s596_s6, %s596_s6, %s597_s8  }
  0x3c   : > { %p825_p5 = scmp.ne.s32.totalorder %s822_s23, 0 }
  0x3d   : > { %p826_p12 = scmp.eq.s32.totalorder (!%p825_p5), %s636_s13, 0 }
  0x3e   : > { %144 = sbr.rel (%p825_p5) target bundleno = 324 (0x144), region = 28 }
  0x43   : > { %567 = dma.done.wait (%p826_p12), [#allocation3], 128   ;;  %p827_p2 = pmov %p826_p12 }
  0x44   : > { %s738_s14 = sand.u32 1, %s584_s10   ;;  %p828_p6 = scmp.ne.s32.totalorder %s819_s20, 0 }
  0x45   : > { %569 = vsyncadd (%p827_p2), [#allocation3], 4294967168  ;;  %s405_s19 = smul.u32 176, %s738_s14  ;;  %s151_s24 = scalar_lea.sflag [#allocation6], %s738_s14 }
  0x47   : > { %s742_s25 = scalar_lea.vmem [#allocation5], %s405_s19 }
  0x48   : > { %571 = dma.done.wait (%p828_p6), %s151_s24, 2816  }
  0x49   : > { %573 = vsyncadd (%p828_p6), %s151_s24, 4294964480  ;;  %v598_v0 = vmov 0.0   ;;  %v197_v1 = vld [vmem:[%s742_s25 + $0xa8] sm:$0xff]  ;;  %v196_v2 = vld [vmem:[%s742_s25 + $0xa0] sm:$0xff]  ;;  %vm198_vm0 = vcmask 719872   ;;  %s395_s20 = sshll.u32 %s738_s14, 4 }
  0x4a   : > { %266 = vmatprep.mubr.f32.mxu0 %v598_v0  ;;  %v195_v3 = vld [vmem:[%s742_s25 + $0x98] sm:$0xff]  ;;  %212 = vmatprep.subr.mxu0 %v197_v1  ;;  %v194_v4 = vld [vmem:[%s742_s25 + $0x90] sm:$0xff]  ;;  %v193_v5 = vld [vmem:[%s742_s25 + $0x88] sm:$0xff]  ;;  %s402_s23 = sshll.u32 %s636_s13, 8  ;;  %s174_s28 = scalar_lea.vmem [#allocation7], %s395_s20 }
  0x4b   : > { %213 = vmatpush1.msra.mxu0 %v196_v2  ;;  %v192_v6 = vld [vmem:[%s742_s25 + $0x80] sm:$0xff]  ;;  %v191_v7 = vld [vmem:[%s742_s25 + $0x78] sm:$0xff]  ;;  %v190_v8 = vld [vmem:[%s742_s25 + $0x70] sm:$0xff]  ;;  %s306_s7 = sshll.u32 %s174_s28, 4  ;;  %s775_s26 = scalar_lea.hbm %s813_s2, %s402_s23  ;;  %s307_s7 = int_to_ptr.vmem [resolvable:$true] %s306_s7 }
  0x4c   : > { %214 = vmatprep.subr.mxu0 %v195_v3  ;;  %v189_v9 = vld [vmem:[%s742_s25 + $0x68] sm:$0xff]  ;;  %v188_v10 = vld [vmem:[%s742_s25 + $0x60] sm:$0xff]  ;;  %v187_v11 = vld [vmem:[%s742_s25 + $0x58] sm:$0xff]  ;;  %s292_s13 = scalar_lea.sflag [#allocation4], %s738_s14  ;;  %s524_s29 = scalar_lea.vmem %s307_s7, 256 }
  0x4d   : > { %215 = vmatpush1.msra.mxu0 %v194_v4  ;;  %v186_v12 = vld [vmem:[%s742_s25 + $0x50] sm:$0xff]  ;;  %v185_v13 = vld [vmem:[%s742_s25 + $0x48] sm:$0xff]  ;;  %v184_v14 = vld [vmem:[%s742_s25 + $0x40] sm:$0xff]  ;;  %p525_p13 = scmp.ne.s32.totalorder %s307_s7, %s524_s29  ;;  %p829_p3 = scmp.ne.s32.totalorder %s820_s21, 0 }
  0x4e   : > { %216 = vmatprep.subr.mxu0 %v193_v5  ;;  %v183_v15 = vld [vmem:[%s742_s25 + $0x38] sm:$0xff]  ;;  %v182_v16 = vld [vmem:[%s742_s25 + $0x30] sm:$0xff]  ;;  %v181_v17 = vld [vmem:[%s742_s25 + $0x28] sm:$0xff]  ;;  %s599_s30 = smov [#allocation7]  }
  0x4f   : > { %217 = vmatpush1.msra.mxu0 %v192_v6  ;;  %v180_v18 = vld [vmem:[%s742_s25 + $0x20] sm:$0xff]  ;;  %v179_v19 = vld [vmem:[%s742_s25 + $0x18] sm:$0xff]  ;;  %v178_v20 = vld [vmem:[%s742_s25 + $0x10] sm:$0xff]  ;;  %p526_p0 = pnand %p525_p13, %p829_p3  ;;  %s528_s27 = sshll.u32 %s599_s30, 4  ;;  %s529_s27 = int_to_ptr.vmem [resolvable:$false] %s528_s27 }
  0x50   : > { %218 = vmatprep.subr.mxu0 %v191_v7  ;;  %v177_v21 = vld [vmem:[%s742_s25 + $0x8] sm:$0xff]  ;;  %v176_v22 = vld [vmem:[%s742_s25] sm:$0xff]  ;;  %s530_s3 = scalar_lea.vmem %s529_s27, 512  ;;  %p531_p8 = scmp.lt.s32.totalorder %s307_s7, %s529_s27 }
  0x51   : > { %219 = vmatpush1.msra.mxu0 %v190_v8  ;;  %v175_v23 = vld [vmem:[#allocation2] sm:$0xff]  ;;  %p527_p7 = pneg %p526_p0  ;;  %p532_p9 = scmp.lt.s32.totalorder %s530_s3, %s524_s29 }
  0x52   : > { %220 = vmatprep.subr.mxu0 %v189_v9 }
  0x53   : > { %221 = vmatpush1.msra.mxu0 %v188_v10  ;;  %p533_p10 = por %p532_p9, %p531_p8 }
  0x54   : > { %222 = vmatprep.subr.mxu0 %v187_v11 }
  0x55   : > { %223 = vmatpush1.msra.mxu0 %v186_v12  ;;  %p534_p1 = pnand %p533_p10, %p527_p7 }
  0x56   : > { %224 = vmatprep.subr.mxu0 %v185_v13 }
  0x57   : > { %225 = vmatpush1.msra.mxu0 %v184_v14 }
  0x58   : > { %226 = vmatprep.subr.mxu0 %v183_v15 }
  0x59   : > { %227 = vmatpush1.msra.mxu0 %v182_v16 }
  0x5a   : > { %228 = vmatprep.subr.mxu0 %v181_v17 }
  0x5b   : > { %229 = vmatpush1.msra.mxu0 %v180_v18 }
  0x5c   : > { %230 = vmatprep.subr.mxu0 %v179_v19 }
  0x5d   : > { %231 = vmatpush1.msra.mxu0 %v178_v20 }
  0x5e   : > { %232 = vmatprep.subr.mxu0 %v177_v21 }
  0x5f   : > { %233 = vmatpush1.msra.mxu0 %v176_v22 }
  0x60   : > { %396 = vmatmul.mubr.msk.f32.vlgmr.msra.gmra.mxu0 %vm198_vm0, %v175_v23 }
 0x120   : > { %v268_v24 = vpop.f32.mrf.mxu0 }
 0x121   : > { %v273_v25 = vmax.f32 %v268_v24, 0.0 }
 0x122   : > { %v270_v26 = vpop.f32.mrf.mxu0 }
 0x123   : > { %466 = vrsqrt.f32 %v273_v25  ;;  %v274_v27 = vmax.f32 %v270_v26, 0.0  ;;  %vm277_vm1 = vcmp.eq.f32.partialorder %v273_v25, inf  ;;  %v280_v31 = vand.u32 2147483648, %v273_v25 }
 0x124   : > { %vm279_vm2 = vcmp.eq.f32.partialorder %v273_v25, 0.0 }
 0x125   : > { %468 = vrsqrt.f32 %v274_v27  ;;  %vm284_vm3 = vcmp.eq.f32.partialorder %v274_v27, inf  ;;  %v287_v35 = vand.u32 2147483648, %v274_v27  ;;  %vm286_vm4 = vcmp.eq.f32.partialorder %v274_v27, 0.0 }
 0x130   : > { %v467_v28 = vpop.eup %466 }
 0x131   : > { %v276_v29 = vmul.f32 %v467_v28, %v273_v25 }
 0x132   : > { %v469_v30 = vpop.eup %468 }
 0x133   : > { %v278_v32 = vsel %vm277_vm1, %v273_v25, %v276_v29  ;;  %v283_v33 = vmul.f32 %v469_v30, %v274_v27 }
 0x134   : > { %v281_v34 = vsel %vm279_vm2, %v280_v31, %v278_v32 }
 0x135   : > { %v285_v36 = vsel %vm284_vm3, %v274_v27, %v283_v33  ;;  %289 = vst [vmem:[%s174_s28] sm:$0xff] %v281_v34 }
 0x136   : > { %v288_v37 = vsel %vm286_vm4, %v287_v35, %v285_v36 }
 0x137   : > { %290 = vst [vmem:[%s174_s28 + $0x8] sm:$0xff] %v288_v37 }
 0x138   : > { %537 = shalt.err (!%p534_p1)
}
 0x139   : > { %s538_s4 = scalar_lea.hbm %s775_s26, 256  ;;  %s542_s8 = scalar_lea.hbm %s813_s2, 1024 }
 0x13a   : > { %p539_p4 = scmp.ne.s32.totalorder %s775_s26, %s538_s4  ;;  %p543_p12 = scmp.lt.s32.totalorder %s775_s26, %s813_s2 }
 0x13b   : > { %p544_p2 = scmp.lt.s32.totalorder %s542_s8, %s538_s4 }
 0x13c   : > { %p540_p11 = pnand %p539_p4, %p829_p3 }
 0x13d   : > { %p545_p6 = por %p544_p2, %p543_p12 }
 0x13e   : > { %p541_p5 = pneg %p540_p11 }
 0x140   : > { %p546_p13 = pnand %p545_p6, %p541_p5 }
 0x142   : > { %549 = shalt.err (!%p546_p13)
}
 0x143   : > { %412 = dma.vmem_to_hbm [thread:$0]  (%p829_p3), %s307_s7, 256, %s775_s26, %s292_s13  }
 0x144 PF: > { %p429_p0 = scmp.ge.s32.totalorder %s592_s12, 2  ;;  %s318_s24 = sand.u32 1, %s580_s9  }
 0x145   : > { %p830_p7 = scmp.ne.s32.totalorder %s821_s22, 0  ;;  %s319_s25 = scalar_lea.sflag [#allocation4], %s318_s24 }
 0x147   : > { %p423_p8 = pnand %p429_p0, %p830_p7 }
 0x149   : > { %p424_p9 = pneg %p423_p8 }
 0x14b   : > { %575 = dma.done.wait (%p424_p9), %s319_s25, 256  }
 0x14c   : > { %577 = vsyncadd (%p424_p9), %s319_s25, 4294967040  ;;  %p16_p10 = scmp.ge.s32.totalorder %s640_s15, 6   ;;  %s831_s9 = smov %s584_s10 }
 0x14d   : > { %s832_s10 = smov %s588_s11  ;;  %s833_s11 = smov %s652_s18 }
 0x14e   : > { %s834_s12 = smov %s640_s15  ;;  %18 = sbr.rel (!%p16_p10) target bundleno = 6 (0x6), region = 78 }
 0x153   :  { %324 = vsyncpa [#allocation3], 1 }
 0x154   :  { %326 = vsyncpa [#allocation3 + $0x1], 1 }
 0x155   :  { %327 = vsyncpa [#allocation6], 1 }
 0x156   :  { %329 = vsyncpa [#allocation6 + $0x1], 1 }
 0x157   :  { %330 = vsyncpa [#allocation4], 1 }
 0x158   :  { %332 = vsyncpa [#allocation4 + $0x1], 1 }

</bundles_post_ra>
